<compile_context>
chip_gen: v7x
topology: tpu7x:2x2x1
jax: 0.10.0
libtpu: 0.0.40
codegen_flags: <defaults>
</compile_context>

<pallas_src>
import functools
import math

import numpy as np
import jax
import jax.numpy as jnp
from jax import lax
from jax.experimental import pallas as pl
from jax.experimental.pallas import tpu as pltpu

BBOX_XFORM_CLIP = math.log(1000.0 / 16.0)
# BoxCoder default weights (10, 10, 5, 5): wx == wy and ww == wh.
INV_W_CTR = 1.0 / 10.0
INV_W_SZ = 1.0 / 5.0


def _round_up(x, m):
    return ((x + m - 1) // m) * m


def _choose_block_rows(n, row_bytes, target=256, vmem_budget=12 * 1024 * 1024):
    """Row-block size: ~256 rows, >=4 grid steps for large N (v7x megacore +
    pipeline overlap), even coverage of N, double-buffer footprint <= budget."""
    if n <= target:
        br = _round_up(max(n, 1), 8)
    else:
        nb = max(4, pl.cdiv(n, target))
        br = _round_up(pl.cdiv(n, nb), 8)
    while br > 8 and 2 * br * row_bytes > vmem_budget:   # 2x = double buffering
        br = max(8, _round_up(br // 2, 8))
    return br


# ---------------------------------------------------------------------------
# Fused Pallas kernel: softmax + BoxCoder.decode + clip_to_image
# ---------------------------------------------------------------------------
def _softmax_decode_kernel(logits_ref, reg_ref, aux_ref, prob_ref, box_ref, *, c4):
    # logits: (BR, C)   — true class width, no padding
    # reg:    (BR, W)   — W = round_up(4*C, 128); lanes 4j..4j+3 = (dx, dy, dw, dh)
    # aux:    (BR, 8)   — [w, h, ctr_x, ctr_y, img_w-1, img_h-1, 0, 0] (precomputed)
    # prob:   (BR, C)
    # box:    (BR, c4)  — lanes 4j..4j+3 = decoded+clipped (x1, y1, x2, y2) of class j

    # --- softmax over classes -------------------------------------------------
    x = logits_ref[...].astype(jnp.float32)
    m = jnp.max(x, axis=-1, keepdims=True)
    e = jnp.exp(x - m)
    denom = jnp.sum(e, axis=-1, keepdims=True)
    prob_ref[...] = (e * pl.reciprocal(denom, approx=False)).astype(prob_ref.dtype)

    # --- box decode + clip ------------------------------------------------------
    reg = reg_ref[...].astype(jnp.float32)
    aux = aux_ref[...].astype(jnp.float32)
    w, h = aux[:, 0:1], aux[:, 1:2]
    cx, cy = aux[:, 2:3], aux[:, 3:4]
    lx, ly = aux[:, 4:5], aux[:, 5:6]

    W = reg.shape[1]
    lane = lax.broadcasted_iota(jnp.int32, (1, W), 1)   # (1, W): row-invariant masks
    is_y = (lane & 1) == 1          # y1 / y2 lanes
    is_hi = (lane & 2) != 0         # x2 / y2 lanes

    # Center deltas (dx, dy) live at lanes 4j+{0,1}; size deltas (dw, dh) at 4j+{2,3}.
    # roll(reg, +2)[k] == reg[k-2]; roll(reg, W-2)[k] == reg[k+2] (wrapped lanes unused).
    ctr_delta = jnp.where(is_hi, pltpu.roll(reg, 2, axis=1), reg)
    sz_delta = jnp.where(is_hi, reg, pltpu.roll(reg, W - 2, axis=1))

    dim = jnp.where(is_y, h, w)     # per-ROI width/height broadcast across lanes
    ctr = jnp.where(is_y, cy, cx)
    lim = jnp.where(is_y, ly, lx)

    pred_ctr = (ctr_delta * INV_W_CTR) * dim + ctr
    half = 0.5 * jnp.exp(jnp.minimum(sz_delta * INV_W_SZ, BBOX_XFORM_CLIP)) * dim

    out = jnp.where(is_hi, pred_ctr + half - 1.0, pred_ctr - half)
    out = jnp.clip(out, 0.0, lim)
    box_ref[...] = out[:, :c4].astype(box_ref.dtype)


def pallas_softmax_decode(class_logits, box_regression, concat_boxes, lims):
    """Fused: F.softmax(class_logits, -1) and BoxCoder(10,10,5,5).decode +
    clip_to_image(remove_empty=False). Returns (probs (N, C), boxes (N, C, 4))."""
    N, C = class_logits.shape
    C4 = box_regression.shape[1]
    assert C4 == 4 * C, "box_regression width must be 4 * num_classes"

    W = _round_up(C4, 128)
    reg = box_regression.astype(jnp.float32)
    if W != C4:
        # Lane pad only (needed so the +/-2 lane rolls run on a 128-aligned width).
        reg = jnp.pad(reg, ((0, 0), (0, W - C4)))

    # Precompute per-ROI width/height/center/limits on the wrapper side (tiny N x 8).
    boxes = concat_boxes.astype(jnp.float32)
    widths = boxes[:, 2] - boxes[:, 0] + 1.0
    heights = boxes[:, 3] - boxes[:, 1] + 1.0
    ctr_x = boxes[:, 0] + 0.5 * widths
    ctr_y = boxes[:, 1] + 0.5 * heights
    zeros = jnp.zeros_like(widths)
    aux = jnp.stack([widths, heights, ctr_x, ctr_y,
                     lims[:, 0].astype(jnp.float32), lims[:, 1].astype(jnp.float32),
                     zeros, zeros], axis=1)                               # (N, 8)

    row_bytes = 4 * (C + W + 8 + C + C4)
    BR = _choose_block_rows(N, row_bytes)
    grid = (pl.cdiv(N, BR),)   # ceil-div grid: no row-padding copy, edge block masked

    probs, boxes_flat = pl.pallas_call(
        functools.partial(_softmax_decode_kernel, c4=C4),
        out_shape=(jax.ShapeDtypeStruct((N, C), class_logits.dtype),
                   jax.ShapeDtypeStruct((N, C4), jnp.float32)),
        grid=grid,
        in_specs=[pl.BlockSpec((BR, C), lambda i: (i, 0)),
                  pl.BlockSpec((BR, W), lambda i: (i, 0)),
                  pl.BlockSpec((BR, 8), lambda i: (i, 0))],
        out_specs=(pl.BlockSpec((BR, C), lambda i: (i, 0)),
                   pl.BlockSpec((BR, C4), lambda i: (i, 0))),
        compiler_params=pltpu.CompilerParams(
            dimension_semantics=("parallel",),
            vmem_limit_bytes=32 * 1024 * 1024),
    )(class_logits, reg, aux)
    return probs, boxes_flat.reshape(N, C, 4)   # trailing-dim reshape (no slice copy)


# ---------------------------------------------------------------------------
# NMS / filtering — single jitted call, vmapped over classes AND images.
# ---------------------------------------------------------------------------
def _make_batched_filter(score_thresh, nms_thresh, topn):
    """filter_results with nms_filter_duplicates=True; static-shape device outputs."""

    def nms_keep(boxes, scores, valid):
        # Greedy legacy NMS (+1 areas, suppress if IoU > thr); keep mask in orig order.
        # IoU row is recomputed per step -> O(n) memory (no n x n matrix in HBM).
        n = boxes.shape[0]
        s = jnp.where(valid, scores, -jnp.inf)
        order = jnp.argsort(-s)
        b = boxes[order]
        v = valid[order]
        x1, y1, x2, y2 = b[:, 0], b[:, 1], b[:, 2], b[:, 3]
        areas = (x2 - x1 + 1.0) * (y2 - y1 + 1.0)
        idx = jnp.arange(n)

        def body(i, keep):
            iw = jnp.maximum(jnp.minimum(x2[i], x2) - jnp.maximum(x1[i], x1) + 1.0, 0.0)
            ih = jnp.maximum(jnp.minimum(y2[i], y2) - jnp.maximum(y1[i], y1) + 1.0, 0.0)
            inter = iw * ih
            union = areas[i] + areas - inter
            # Guarded denominator: degenerate (clipped) boxes never yield NaN IoU.
            iou = jnp.where(union > 0.0,
                            inter / jnp.where(union > 0.0, union, 1.0), 0.0)
            suppress = keep[i] & (iou > nms_thresh) & (idx > i)
            return keep & ~suppress

        keep_sorted = lax.fori_loop(0, n, body, v)
        # boxlist_nms: keep only the post_nms_per_cls_topn highest-scoring kept boxes
        rank = jnp.cumsum(keep_sorted.astype(jnp.int32))
        keep_sorted = keep_sorted & (rank <= topn)
        return jnp.zeros((n,), dtype=bool).at[order].set(keep_sorted)

    nms_over_classes = jax.vmap(nms_keep, in_axes=(0, 0, 0))

    def per_image(probs, boxes_per_cls, row_valid):
        n = probs.shape[0]
        inds_all = (probs > score_thresh) & row_valid[:, None]
        keep_fg = nms_over_classes(
            jnp.swapaxes(boxes_per_cls[:, 1:, :], 0, 1),   # (C-1, n, 4)
            probs[:, 1:].T,                                # (C-1, n)
            inds_all[:, 1:].T)                             # (C-1, n)
        keep_mask = jnp.concatenate(
            [jnp.zeros((n, 1), dtype=bool), keep_fg.T], axis=1)   # background zeroed
        dist = probs * keep_mask.astype(probs.dtype)
        return jnp.max(dist, axis=1), jnp.argmax(dist, axis=1)

    # TODO(synk): the per-class greedy NMS stays a sequential fori_loop (vmapped over
    # classes/images); a blocked in-VMEM Pallas NMS kernel is a possible follow-up.
    return jax.jit(jax.vmap(per_image, in_axes=(0, 0, 0)))


# ---------------------------------------------------------------------------
# PostProcessor
# ---------------------------------------------------------------------------
class PostProcessorPallas:
    def __init__(self, score_thresh=0.05, nms=0.5, post_nms_per_cls_topn=300,
                 nms_filter_duplicates=True, detections_per_img=100):
        # Only the default nms_filter_duplicates=True path is implemented.
        self.score_thresh = score_thresh
        self.nms = nms
        self.post_nms_per_cls_topn = post_nms_per_cls_topn
        self.nms_filter_duplicates = nms_filter_duplicates
        self.detections_per_img = detections_per_img
        self._filter_fn = _make_batched_filter(score_thresh, nms, post_nms_per_cls_topn)

    def forward(self, features, class_logits, box_regression,
                proposal_boxes_list, image_sizes):
        boxes_per_image = [int(b.shape[0]) for b in proposal_boxes_list]
        B = len(boxes_per_image)
        concat_boxes = jnp.concatenate(proposal_boxes_list, axis=0)
        N, C = class_logits.shape

        # per-row clamp limits (w - 1, h - 1)
        lims = jnp.asarray(np.concatenate(
            [np.tile([[w - 1.0, h - 1.0]], (n, 1))
             for n, (w, h) in zip(boxes_per_image, image_sizes)], axis=0),
            dtype=jnp.float32)

        # hot path: fused softmax + box decode + clip (single pallas_call)
        class_prob, boxes_per_cls_all = pallas_softmax_decode(
            class_logits, box_regression, concat_boxes, lims)

        # Batched per-image filtering: pad to one static max-ROI count -> one jit,
        # one dispatch, one device->host transfer.
        n_max = max(boxes_per_image)
        offsets = np.cumsum([0] + boxes_per_image)
        if all(n == n_max for n in boxes_per_image):
            probs_b = class_prob.reshape(B, n_max, C)
            boxes_b = boxes_per_cls_all.reshape(B, n_max, C, 4)
        else:
            probs_b = jnp.stack([
                jnp.pad(class_prob[offsets[i]:offsets[i + 1]],
                        ((0, n_max - boxes_per_image[i]), (0, 0)))
                for i in range(B)])
            boxes_b = jnp.stack([
                jnp.pad(boxes_per_cls_all[offsets[i]:offsets[i + 1]],
                        ((0, n_max - boxes_per_image[i]), (0, 0), (0, 0)))
                for i in range(B)])
        valid_b = jnp.asarray(
            np.arange(n_max)[None, :] < np.asarray(boxes_per_image)[:, None])

        scores_pre, labels_pre = self._filter_fn(probs_b, boxes_b, valid_b)
        scores_np, labels_np = jax.device_get((scores_pre, labels_pre))

        # TODO(synk): dynamic-shape nonzero/gather (variable #detections per image)
        # has no static-shape Pallas equivalent; compaction is done on host.
        sel_g_idx, sel_scores, sel_labels, counts = [], [], [], []
        for i, n in enumerate(boxes_per_image):
            s = scores_np[i, :n]
            l = labels_np[i, :n]
            final_inds = np.nonzero(s)[0]
            sc = s[final_inds]
            lb = l[final_inds]
            ndet = final_inds.shape[0]
            if ndet > self.detections_per_img > 0:
                kth = ndet - self.detections_per_img + 1
                image_thresh = np.partition(sc, kth - 1)[kth - 1]
                keep = np.nonzero(sc >= image_thresh)[0]
                final_inds, sc, lb = final_inds[keep], sc[keep], lb[keep]
            sel_g_idx.append((offsets[i] + final_inds).astype(np.int32))
            sel_scores.append(sc.astype(np.float32))
            sel_labels.append(lb.astype(np.int32))
            counts.append(int(final_inds.shape[0]))

        g_idx = jnp.asarray(np.concatenate(sel_g_idx))
        g_lbl = jnp.asarray(np.concatenate(sel_labels))

        # Batched gathers — single device calls instead of per-image dispatches.
        sel_boxes_per_cls = boxes_per_cls_all[g_idx]                       # (K, C, 4)
        sel_bbox = sel_boxes_per_cls[jnp.arange(g_idx.shape[0]), g_lbl]    # (K, 4)
        nms_features = features[g_idx]

        results = []
        start = 0
        for i, ((w, h), k) in enumerate(zip(image_sizes, counts)):
            end = start + k
            results.append({
                "bbox": sel_bbox[start:end],
                "pred_scores": jnp.asarray(sel_scores[i]),
                "pred_labels": jnp.asarray(sel_labels[i]),
                "boxes_per_cls": sel_boxes_per_cls[start:end],
                "size": (w, h),
            })
            start = end
        return nms_features, results


# ---------------------------------------------------------------------------
if __name__ == "__main__":
    key = jax.random.PRNGKey(0)
    num_classes = 8
    feat_dim = 32
    boxes_per_image = [8, 8]
    image_sizes = [(64, 48), (48, 64)]  # (w, h)
    N = sum(boxes_per_image)

    k_box0, k_box1, k_logit, k_reg, k_feat = jax.random.split(key, 5)

    def make_boxes(k, n, w, h):
        ka, kb = jax.random.split(k)
        xy = jax.random.uniform(ka, (n, 2), minval=0.0, maxval=0.4 * min(w, h))
        wh = jax.random.uniform(kb, (n, 2), minval=4.0, maxval=0.5 * min(w, h))
        return jnp.concatenate([xy, xy + wh], axis=1).astype(jnp.float32)

    proposal_boxes = [
        make_boxes(k_box0, boxes_per_image[0], *image_sizes[0]),
        make_boxes(k_box1, boxes_per_image[1], *image_sizes[1]),
    ]
    class_logits = (2.0 * jax.random.normal(k_logit, (N, num_classes))).astype(jnp.float32)
    box_regression = (0.5 * jax.random.normal(k_reg, (N, 4 * num_classes))).astype(jnp.float32)
    features = jax.random.normal(k_feat, (N, feat_dim)).astype(jnp.float32)

    # --- numerical checks of the fused Pallas hot path against pure-JAX refs ---
    concat_boxes = jnp.concatenate(proposal_boxes, axis=0)
    lims = jnp.asarray(np.concatenate(
        [np.tile([[w - 1.0, h - 1.0]], (n, 1))
         for n, (w, h) in zip(boxes_per_image, image_sizes)], axis=0),
        dtype=jnp.float32)

    got_prob, got_boxes = pallas_softmax_decode(class_logits, box_regression,
                                                concat_boxes, lims)

    ref_prob = jax.nn.softmax(class_logits, axis=-1)
    np.testing.assert_allclose(np.asarray(got_prob), np.asarray(ref_prob),
                               rtol=1e-5, atol=1e-5)

    def ref_decode_clip(reg, boxes, lims):
        widths = boxes[:, 2] - boxes[:, 0] + 1.0
        heights = boxes[:, 3] - boxes[:, 1] + 1.0
        ctr_x = boxes[:, 0] + 0.5 * widths
        ctr_y = boxes[:, 1] + 0.5 * heights
        dx = reg[:, 0::4] / 10.0
        dy = reg[:, 1::4] / 10.0
        dw = jnp.minimum(reg[:, 2::4] / 5.0, BBOX_XFORM_CLIP)
        dh = jnp.minimum(reg[:, 3::4] / 5.0, BBOX_XFORM_CLIP)
        pcx = dx * widths[:, None] + ctr_x[:, None]
        pcy = dy * heights[:, None] + ctr_y[:, None]
        pw = jnp.exp(dw) * widths[:, None]
        ph = jnp.exp(dh) * heights[:, None]
        lx, ly = lims[:, 0:1], lims[:, 1:2]
        x1 = jnp.clip(pcx - 0.5 * pw, 0.0, lx)
        y1 = jnp.clip(pcy - 0.5 * ph, 0.0, ly)
        x2 = jnp.clip(pcx + 0.5 * pw - 1.0, 0.0, lx)
        y2 = jnp.clip(pcy + 0.5 * ph - 1.0, 0.0, ly)
        return jnp.stack([x1, y1, x2, y2], axis=-1)   # (N, C, 4)

    ref_boxes = ref_decode_clip(box_regression, concat_boxes, lims)
    np.testing.assert_allclose(np.asarray(got_boxes), np.asarray(ref_boxes),
                               rtol=1e-5, atol=1e-4)

    # --- full post-processor ---------------------------------------------------
    pp = PostProcessorPallas()
    nms_features, results = pp.forward(features, class_logits, box_regression,
                                       proposal_boxes, image_sizes)
    jax.block_until_ready(nms_features)
    for r in results:
        jax.block_until_ready(r["bbox"])
        jax.block_until_ready(r["pred_scores"])
    print("KERNEL_OK")
</pallas_src>

<mosaic_0001>
module attributes {stable_mosaic.version = 11 : i64} {
  func.func @_softmax_decode_kernel(%arg0: i32, %arg1: memref<16x8xf32, #tpu.memory_space<vmem>>, %arg2: memref<16x128xf32, #tpu.memory_space<vmem>>, %arg3: memref<16x8xf32, #tpu.memory_space<vmem>>, %arg4: memref<16x8xf32, #tpu.memory_space<vmem>>, %arg5: memref<16x32xf32, #tpu.memory_space<vmem>>) attributes {dimension_semantics = [#tpu.dimension_semantics<parallel>], iteration_bounds = array<i64: 1>, scalar_prefetch = 0 : i64, scratch_operands = 0 : i64, tpu.core_type = #tpu.core_type<tc>, window_params = [{transform_indices = @transform_0, window_bounds = array<i64: 16, 8>}, {transform_indices = @transform_1, window_bounds = array<i64: 16, 128>}, {transform_indices = @transform_2, window_bounds = array<i64: 16, 8>}, {transform_indices = @transform_3, window_bounds = array<i64: 16, 8>}, {transform_indices = @transform_4, window_bounds = array<i64: 16, 32>}]} {
    %c0 = arith.constant 0 : index
    %c0_0 = arith.constant 0 : index
    %0 = vector.load %arg1[%c0, %c0_0] : memref<16x8xf32, #tpu.memory_space<vmem>>, vector<16x8xf32>
    %cst = arith.constant dense<0xFF800000> : vector<16xf32>
    %1 = vector.multi_reduction <maximumf>, %0, %cst [1] : vector<16x8xf32> to vector<16xf32>
    %2 = vector.shape_cast %1 : vector<16xf32> to vector<16x1xf32>
    %3 = vector.broadcast %2 : vector<16x1xf32> to vector<16x8xf32>
    %4 = arith.subf %0, %3 : vector<16x8xf32>
    %5 = math.exp %4 : vector<16x8xf32>
    %cst_1 = arith.constant dense<0.000000e+00> : vector<16xf32>
    %6 = vector.multi_reduction <add>, %5, %cst_1 [1] : vector<16x8xf32> to vector<16xf32>
    %7 = vector.shape_cast %6 : vector<16xf32> to vector<16x1xf32>
    %8 = tpu.reciprocal %7 : vector<16x1xf32> -> vector<16x1xf32>
    %9 = vector.broadcast %8 : vector<16x1xf32> to vector<16x8xf32>
    %10 = arith.mulf %5, %9 : vector<16x8xf32>
    %c0_2 = arith.constant 0 : index
    %c0_3 = arith.constant 0 : index
    %11 = vector.load %arg4[%c0_2, %c0_3] : memref<16x8xf32, #tpu.memory_space<vmem>>, vector<16x8xf32>
    tpu.vector_store %arg4[%c0_2, %c0_3], %10 {strides = array<i32>} : memref<16x8xf32, #tpu.memory_space<vmem>>, vector<16x8xf32>,
    %c0_4 = arith.constant 0 : index
    %c0_5 = arith.constant 0 : index
    %12 = vector.load %arg2[%c0_4, %c0_5] : memref<16x128xf32, #tpu.memory_space<vmem>>, vector<16x128xf32>
    %c0_6 = arith.constant 0 : index
    %c0_7 = arith.constant 0 : index
    %13 = vector.load %arg3[%c0_6, %c0_7] : memref<16x8xf32, #tpu.memory_space<vmem>>, vector<16x8xf32>
    %14 = vector.extract_strided_slice %13 {offsets = [0, 0], sizes = [16, 1], strides = [1, 1]} : vector<16x8xf32> to vector<16x1xf32>
    %15 = vector.extract_strided_slice %13 {offsets = [0, 1], sizes = [16, 1], strides = [1, 1]} : vector<16x8xf32> to vector<16x1xf32>
    %16 = vector.extract_strided_slice %13 {offsets = [0, 2], sizes = [16, 1], strides = [1, 1]} : vector<16x8xf32> to vector<16x1xf32>
    %17 = vector.extract_strided_slice %13 {offsets = [0, 3], sizes = [16, 1], strides = [1, 1]} : vector<16x8xf32> to vector<16x1xf32>
    %18 = vector.extract_strided_slice %13 {offsets = [0, 4], sizes = [16, 1], strides = [1, 1]} : vector<16x8xf32> to vector<16x1xf32>
    %19 = vector.extract_strided_slice %13 {offsets = [0, 5], sizes = [16, 1], strides = [1, 1]} : vector<16x8xf32> to vector<16x1xf32>
    %20 = tpu.iota {dimensions = array<i32: 1>} : vector<1x128xi32>
    %c1_i32 = arith.constant 1 : i32
    %21 = vector.broadcast %c1_i32 : i32 to vector<1x128xi32>
    %22 = arith.andi %20, %21 : vector<1x128xi32>
    %c1_i32_8 = arith.constant 1 : i32
    %23 = vector.broadcast %c1_i32_8 : i32 to vector<1x128xi32>
    %24 = arith.cmpi eq, %22, %23 : vector<1x128xi32>
    %c2_i32 = arith.constant 2 : i32
    %25 = vector.broadcast %c2_i32 : i32 to vector<1x128xi32>
    %26 = arith.andi %20, %25 : vector<1x128xi32>
    %c0_i32 = arith.constant 0 : i32
    %27 = vector.broadcast %c0_i32 : i32 to vector<1x128xi32>
    %28 = arith.cmpi ne, %26, %27 : vector<1x128xi32>
    %c2_i32_9 = arith.constant 2 : i32
    %29 = tpu.dynamic_rotate %12 by %c2_i32_9 dim 1 : vector<16x128xf32>, i32 -> vector<16x128xf32>
    %30 = vector.shape_cast %28 : vector<1x128xi1> to vector<1x128xi1>
    %31 = vector.broadcast %30 : vector<1x128xi1> to vector<16x128xi1>
    %32 = arith.select %31, %29, %12 : vector<16x128xi1>, vector<16x128xf32>
    %c126_i32 = arith.constant 126 : i32
    %33 = tpu.dynamic_rotate %12 by %c126_i32 dim 1 : vector<16x128xf32>, i32 -> vector<16x128xf32>
    %34 = vector.shape_cast %28 : vector<1x128xi1> to vector<1x128xi1>
    %35 = vector.broadcast %34 : vector<1x128xi1> to vector<16x128xi1>
    %36 = arith.select %35, %12, %33 : vector<16x128xi1>, vector<16x128xf32>
    %37 = vector.shape_cast %24 : vector<1x128xi1> to vector<1x128xi1>
    %38 = vector.broadcast %37 : vector<1x128xi1> to vector<16x128xi1>
    %39 = vector.shape_cast %15 : vector<16x1xf32> to vector<16x1xf32>
    %40 = vector.broadcast %39 : vector<16x1xf32> to vector<16x128xf32>
    %41 = vector.shape_cast %14 : vector<16x1xf32> to vector<16x1xf32>
    %42 = vector.broadcast %41 : vector<16x1xf32> to vector<16x128xf32>
    %43 = arith.select %38, %40, %42 : vector<16x128xi1>, vector<16x128xf32>
    %44 = vector.shape_cast %24 : vector<1x128xi1> to vector<1x128xi1>
    %45 = vector.broadcast %44 : vector<1x128xi1> to vector<16x128xi1>
    %46 = vector.shape_cast %17 : vector<16x1xf32> to vector<16x1xf32>
    %47 = vector.broadcast %46 : vector<16x1xf32> to vector<16x128xf32>
    %48 = vector.shape_cast %16 : vector<16x1xf32> to vector<16x1xf32>
    %49 = vector.broadcast %48 : vector<16x1xf32> to vector<16x128xf32>
    %50 = arith.select %45, %47, %49 : vector<16x128xi1>, vector<16x128xf32>
    %51 = vector.shape_cast %24 : vector<1x128xi1> to vector<1x128xi1>
    %52 = vector.broadcast %51 : vector<1x128xi1> to vector<16x128xi1>
    %53 = vector.shape_cast %19 : vector<16x1xf32> to vector<16x1xf32>
    %54 = vector.broadcast %53 : vector<16x1xf32> to vector<16x128xf32>
    %55 = vector.shape_cast %18 : vector<16x1xf32> to vector<16x1xf32>
    %56 = vector.broadcast %55 : vector<16x1xf32> to vector<16x128xf32>
    %57 = arith.select %52, %54, %56 : vector<16x128xi1>, vector<16x128xf32>
    %cst_10 = arith.constant 1.000000e-01 : f32
    %58 = vector.broadcast %cst_10 : f32 to vector<16x128xf32>
    %59 = arith.mulf %32, %58 : vector<16x128xf32>
    %60 = arith.mulf %59, %43 : vector<16x128xf32>
    %61 = arith.addf %60, %50 : vector<16x128xf32>
    %cst_11 = arith.constant 2.000000e-01 : f32
    %62 = vector.broadcast %cst_11 : f32 to vector<16x128xf32>
    %63 = arith.mulf %36, %62 : vector<16x128xf32>
    %cst_12 = arith.constant 4.13516665 : f32
    %64 = vector.broadcast %cst_12 : f32 to vector<16x128xf32>
    %65 = arith.minimumf %63, %64 : vector<16x128xf32>
    %66 = math.exp %65 : vector<16x128xf32>
    %cst_13 = arith.constant 5.000000e-01 : f32
    %67 = vector.broadcast %cst_13 : f32 to vector<16x128xf32>
    %68 = arith.mulf %67, %66 : vector<16x128xf32>
    %69 = arith.mulf %68, %43 : vector<16x128xf32>
    %70 = arith.addf %61, %69 : vector<16x128xf32>
    %cst_14 = arith.constant 1.000000e+00 : f32
    %71 = vector.broadcast %cst_14 : f32 to vector<16x128xf32>
    %72 = arith.subf %70, %71 : vector<16x128xf32>
    %73 = arith.subf %61, %69 : vector<16x128xf32>
    %74 = vector.shape_cast %28 : vector<1x128xi1> to vector<1x128xi1>
    %75 = vector.broadcast %74 : vector<1x128xi1> to vector<16x128xi1>
    %76 = arith.select %75, %72, %73 : vector<16x128xi1>, vector<16x128xf32>
    %cst_15 = arith.constant 0.000000e+00 : f32
    %77 = vector.broadcast %cst_15 : f32 to vector<16x128xf32>
    %78 = arith.maximumf %77, %76 : vector<16x128xf32>
    %79 = arith.minimumf %57, %78 : vector<16x128xf32>
    %80 = vector.extract_strided_slice %79 {offsets = [0, 0], sizes = [16, 32], strides = [1, 1]} : vector<16x128xf32> to vector<16x32xf32>
    %c0_16 = arith.constant 0 : index
    %c0_17 = arith.constant 0 : index
    %81 = vector.load %arg5[%c0_16, %c0_17] : memref<16x32xf32, #tpu.memory_space<vmem>>, vector<16x32xf32>
    tpu.vector_store %arg5[%c0_16, %c0_17], %80 {strides = array<i32>} : memref<16x32xf32, #tpu.memory_space<vmem>>, vector<16x32xf32>,
    return
  }
  func.func @transform_0(%arg0: i32) -> (i32, i32) {
    %c0_i32 = arith.constant 0 : i32
    %c0_i32_0 = arith.constant 0 : i32
    return %arg0, %c0_i32 : i32, i32
  }
  func.func @transform_1(%arg0: i32) -> (i32, i32) {
    %c0_i32 = arith.constant 0 : i32
    %c0_i32_0 = arith.constant 0 : i32
    return %arg0, %c0_i32 : i32, i32
  }
  func.func @transform_2(%arg0: i32) -> (i32, i32) {
    %c0_i32 = arith.constant 0 : i32
    %c0_i32_0 = arith.constant 0 : i32
    return %arg0, %c0_i32 : i32, i32
  }
  func.func @transform_3(%arg0: i32) -> (i32, i32) {
    %c0_i32 = arith.constant 0 : i32
    %c0_i32_0 = arith.constant 0 : i32
    return %arg0, %c0_i32 : i32, i32
  }
  func.func @transform_4(%arg0: i32) -> (i32, i32) {
    %c0_i32 = arith.constant 0 : i32
    %c0_i32_0 = arith.constant 0 : i32
    return %arg0, %c0_i32 : i32, i32
  }
}

</mosaic_0001>

<bundles_post_ra>
// kernel: tpu_custom_call.1
= control target key start
LH: loop header
LB: loop body
LE: loop exit
PB: predicated region body
PF: predicated region fallthrough
CT: control target
= control target key end

     0   :  { %vm19_vm0 = vcmask 64512   ;;  %s240_s21 = smov 126   ;;  %v241_v4 = vmov 1   ;;  %s370_s0 = inlined_call_operand.vmem [shape: f32[16,8], index: 0, kind: input, shape index: {}]   ;;  %s371_s1 = inlined_call_operand.vmem [shape: f32[16,128], index: 1, kind: input, shape index: {}]   ;;  %s372_s2 = inlined_call_operand.vmem [shape: f32[16,8], index: 2, kind: input, shape index: {}]   ;;  %s373_s3 = inlined_call_operand.vmem [shape: f32[16,8], index: 3, kind: output, shape index: {0}]   ;;  %s374_s4 = inlined_call_operand.hbm [shape: f32[16,32], index: 4, kind: output, shape index: {1}]  }
   0x1   :  { %v17_v0 = vld [vmem:[%s370_s0] sm:$0xff]  ;;  %v18_v1 = vld [vmem:[%s370_s0 + $0x8] sm:$0xff]  ;;  %192 = vset.pattern.permute.xlu0 %v241_v4  ;;  %193 = vset.pattern.permute.xlu1 %v241_v4 }
   0x2   :  { %v285_v2 = vld [vmem:[%s371_s1] sm:$0xff]  ;;  %v20_v3 = vsel %vm19_vm0, %v17_v0, -inf  ;;  %v292_v5 = vld [vmem:[%s371_s1 + $0x8] sm:$0xff] }
   0x3   :  { %62 = vrot.lane.b32.xlu1 %v285_v2, %s240_s21  ;;  %21 = vmax.xlane.f32.xlu0 %v20_v3 }
   0x4   :  { %10 = vsyncpa [#allocation3], 0  ;;  %v23_v6 = vsel %vm19_vm0, %v18_v1, -inf  ;;  %v47_v7 = vld [vmem:[%s372_s2 + $0x8] sm:$0xff]  ;;  %v242_v8 = vmov 0   ;;  %v243_v9 = vmov 3   ;;  %v48_v26 = vlaneseq }
   0x5   :  { %v46_v10 = vld [vmem:[%s372_s2] sm:$0xff]  ;;  %v244_v11 = vmov 2   ;;  %s245_s26 = smov 2   ;;  %v246_v12 = vmov 5   ;;  %v247_v13 = vmov 4   ;;  %s248_s2 = smov [#allocation2]  }
   0x6   :  { %v49_v27 = vand.u32 127, %v48_v26  ;;  %s166_s27 = sshll.u32 %s248_s2, 4  ;;  %vm156_vm3 = vcmask 261120   ;;  %s167_s27 = int_to_ptr.vmem [resolvable:$true] %s166_s27 }
   0x7   :  { %64 = vrot.lane.b32.xlu1 %v292_v5, %s240_s21  ;;  %24 = vmax.xlane.f32.xlu0 %v23_v6  ;;  %s216_s28 = scalar_lea.vmem %s167_s27, 256  ;;  %p221_p1 = scmp.lt.s32.totalorder %s167_s27, %s167_s27 }
   0x8   :  { %v52_v29 = vand.u32 2, %v49_v27  ;;  %v50_v45 = vand.u32 1, %v49_v27  ;;  %p217_p0 = scmp.ne.s32.totalorder %s167_s27, %s216_s28  ;;  %p222_p2 = scmp.lt.s32.totalorder %s216_s28, %s216_s28 }
   0xa   :  { %vm312_vm1 = vcmp.ne.s32.totalorder %v52_v29, 0  ;;  %vm328_vm2 = vcmp.eq.s32.totalorder %v50_v45, 1  ;;  %p223_p3 = por %p222_p2, %p221_p1 }
   0xb   :  { %77 = vperm.xlu1 %193, %v47_v7  }
   0xc   :  { %p224_p4 = pnand %p223_p3, %p217_p0 }
   0xf   :  { %195 = vset.pattern.permute.xlu1 %v242_v8 }
  0x10   :  { %85 = vperm.xlu1 %195, %v47_v7  }
  0x14   :  { %197 = vset.pattern.permute.xlu1 %v243_v9 }
  0x15   :  { %95 = vperm.xlu1 %197, %v47_v7  }
  0x19   :  { %198 = vset.pattern.permute.xlu1 %v244_v11 }
  0x1a   :  { %99 = vperm.xlu1 %198, %v46_v10  }
  0x1d   :  { %72 = vperm.xlu0 %192, %v46_v10  }
  0x1e   :  { %54 = vrot.lane.b32.xlu1 %v285_v2, %s245_s26 }
  0x1f   :  { %201 = vset.pattern.permute.xlu1 %v246_v12 }
  0x21   :  { %194 = vset.pattern.permute.xlu0 %v242_v8 }
  0x22   :  { %56 = vrot.lane.b32.xlu1 %v292_v5, %s245_s26  ;;  %81 = vperm.xlu0 %194, %v46_v10  }
  0x26   :  { %113 = vperm.xlu1 %201, %v47_v7   ;;  %196 = vset.pattern.permute.xlu0 %v243_v9 }
  0x27   :  { %91 = vperm.xlu0 %196, %v46_v10  }
  0x2a   :  { %202 = vset.pattern.permute.xlu1 %v247_v13 }
  0x2b   :  { %199 = vset.pattern.permute.xlu0 %v244_v11 }
  0x2c   :  { %103 = vperm.xlu0 %199, %v47_v7  }
  0x30   :  { %200 = vset.pattern.permute.xlu0 %v246_v12 }
  0x31   :  { %109 = vperm.xlu0 %200, %v46_v10  }
  0x35   :  { %203 = vset.pattern.permute.xlu0 %v247_v13 }
  0x75   :  { %v63_v24 = vpop.permute.xlu1 %62 }
  0x76   :  { %v66_v32 = vsel %vm312_vm1, %v285_v2, %v63_v24 }
  0x77   :  { %v132_v35 = vmul.f32 0.2, %v66_v32 }
  0x79   :  { %v65_v25 = vpop.permute.xlu1 %64  ;;  %v134_v37 = vmin.f32 %v132_v35, 4.1351666 }
  0x7a   :  { %v67_v33 = vsel %vm312_vm1, %v292_v5, %v65_v25 }
  0x7b   :  { %v133_v36 = vmul.f32 0.2, %v67_v33  ;;  %v136_v41 = vmul.f32 1.442695, %v134_v37 }
  0x7d   :  { %v135_v39 = vmin.f32 %v133_v36, 4.1351666 }
  0x7f   :  { %v138_v42 = vmul.f32 1.442695, %v135_v39 }
  0x8a   :  { %v78_v28 = vpop.permute.xlu1 %77 }
  0x8f   :  { %v86_v30 = vpop.permute.xlu1 %85 }
  0x90   :  { %v22_v14 = vpop.xlane.xlu0 %21  ;;  %v89_v55 = vsel %vm328_vm2, %v78_v28, %v86_v30 }
  0x91   :  { %v26_v15 = vsub.f32 %v17_v0, %v22_v14 }
  0x93   :  { %v28_v16 = vmul.f32 1.442695, %v26_v15 }
  0x94   :  { %v25_v17 = vpop.xlane.xlu0 %24  ;;  %v96_v34 = vpop.permute.xlu1 %95 }
  0x95   :  { %204 = vpow2.f32 %v28_v16  ;;  %v27_v18 = vsub.f32 %v18_v1, %v25_v17 }
  0x97   :  { %v30_v19 = vmul.f32 1.442695, %v27_v18 }
  0x99   :  { %206 = vpow2.f32 %v30_v19  ;;  %v100_v38 = vpop.permute.xlu1 %99 }
  0x9a   :  { %208 = vpow2.f32 %v136_v41 }
  0x9b   :  { %210 = vpow2.f32 %v138_v42 }
  0x9c   :  { %v73_v40 = vpop.permute.xlu0 %72 }
  0x9d   :  { %v55_v43 = vpop.permute.xlu1 %54 }
  0x9e   :  { %v60_v48 = vsel %vm312_vm1, %v55_v43, %v285_v2 }
  0x9f   :  { %v304_v20 = vpop.eup %204  ;;  %v126_v52 = vmul.f32 0.1, %v60_v48 }
  0xa0   :  { %v32_v21 = vsel %vm19_vm0, %v304_v20, 0.0 }
  0xa1   :  { %33 = vadd.xlane.f32.xlu0 %v32_v21  ;;  %v82_v44 = vpop.permute.xlu0 %81  ;;  %v57_v46 = vpop.permute.xlu1 %56 }
  0xa2   :  { %v61_v49 = vsel %vm312_vm1, %v57_v46, %v292_v5  ;;  %v88_v56 = vsel %vm328_vm2, %v73_v40, %v82_v44 }
  0xa3   :  { %v308_v22 = vpop.eup %206  ;;  %v127_v53 = vmul.f32 0.1, %v61_v49  ;;  %v128_v60 = vmul.f32 %v126_v52, %v88_v56 }
  0xa4   :  { %v35_v23 = vsel %vm19_vm0, %v308_v22, 0.0  ;;  %v209_v51 = vpop.eup %208 }
  0xa5   :  { %36 = vadd.xlane.f32.xlu1 %v35_v23  ;;  %v211_v54 = vpop.eup %210  ;;  %v140_v59 = vmul.f32 0.5, %v209_v51  ;;  %v129_v61 = vmul.f32 %v127_v53, %v89_v55  ;;  %v114_v8 = vpop.permute.xlu1 %113 }
  0xa6   :  { %v92_v47 = vpop.permute.xlu0 %91  ;;  %v141_v58 = vmul.f32 0.5, %v211_v54 }
  0xa7   :  { %v106_v62 = vsel %vm328_vm2, %v92_v47, %v100_v38  ;;  %v142_v1 = vmul.f32 %v140_v59, %v88_v56 }
  0xa8   :  { %v143_v0 = vmul.f32 %v141_v58, %v89_v55  ;;  %v130_v2 = vadd.f32 %v128_v60, %v106_v62 }
  0xaa   :  { %v144_v5 = vadd.f32 %v142_v1, %v130_v2 }
  0xab   :  { %v104_v57 = vpop.permute.xlu0 %103 }
  0xac   :  { %v107_v63 = vsel %vm328_vm2, %v96_v34, %v104_v57 }
  0xad   :  { %v131_v3 = vadd.f32 %v129_v61, %v107_v63 }
  0xaf   :  { %v145_v6 = vadd.f32 %v143_v0, %v131_v3  ;;  %v149_v12 = vsub.f32 %v131_v3, %v143_v0 }
  0xb0   :  { %v110_v4 = vpop.permute.xlu0 %109 }
  0xb1   :  { %v180_v11 = vadd.f32 -1.0, %v145_v6 }
  0xb3   :  { %v151_v15 = vsel %vm312_vm1, %v180_v11, %v149_v12 }
  0xb4   :  { %v153_v18 = vmax.f32 %v151_v15, 0.0 }
  0xb6   :  { %117 = vperm.xlu1 %202, %v46_v10   ;;  %v179_v10 = vadd.f32 -1.0, %v144_v5 }
  0xb7   :  { %121 = vperm.xlu0 %203, %v47_v7   ;;  %v148_v7 = vsub.f32 %v130_v2, %v142_v1 }
  0xb9   :  { %v150_v14 = vsel %vm312_vm1, %v179_v10, %v148_v7 }
  0xba   :  { %v152_v17 = vmax.f32 %v150_v14, 0.0 }
 0x12e   :  { %v34_v9 = vpop.xlane.xlu0 %33 }
 0x12f   :  { %212 = vrcp.f32 %v34_v9 }
 0x132   :  { %v37_v13 = vpop.xlane.xlu1 %36 }
 0x133   :  { %214 = vrcp.f32 %v37_v13 }
 0x136   :  { %v118_v16 = vpop.permute.xlu1 %117  ;;  %v122_v19 = vpop.permute.xlu0 %121 }
 0x137   :  { %v124_v21 = vsel %vm328_vm2, %v110_v4, %v118_v16  ;;  %v125_v23 = vsel %vm328_vm2, %v114_v8, %v122_v19 }
 0x138   :  { %v154_v24 = vmin.f32 %v124_v21, %v152_v17  ;;  %v155_v25 = vmin.f32 %v125_v23, %v153_v18 }
 0x139   :  { %v213_v26 = vpop.eup %212 }
 0x13a   :  { %v40_v27 = vmul.f32 %v213_v26, %v304_v20  ;;  %157 = vst.msk [vmem:[#allocation2] sm:$0xff] %vm156_vm3, %v154_v24  ;;  %158 = vst.msk [vmem:[#allocation2 + $0x8] sm:$0xff] %vm156_vm3, %v155_v25 }
 0x13b   :  { %227 = shalt.err (!%p224_p4)
}
 0x13c   :  { %s228_s5 = scalar_lea.hbm %s374_s4, 256 }
 0x13d   :  { %p229_p5 = scmp.ne.s32.totalorder %s374_s4, %s228_s5  ;;  %p232_p6 = scmp.lt.u32.totalorder %s228_s5, %s374_s4 }
 0x13f   :  { %p234_p7 = pnand %p232_p6, %p229_p5 }
 0x141   :  { %237 = shalt.err (!%p234_p7)
}
 0x142   :  { %s249_s10 = smov 128   ;;  %s250_s11 = smov 8   ;;  %42 = vst.msk [vmem:[%s373_s3] sm:$0xff] %vm19_vm0, %v40_v27  ;;  %v215_v20 = vpop.eup %214 }
 0x143   :  { %172 = dma.vmem_to_hbm [thread:$0]  %s167_s27, 256, %s374_s4, [#allocation3], %s249_s10, %s249_s10, %s250_s11   ;;  %v41_v28 = vmul.f32 %v215_v20, %v308_v22 }
 0x145   :  { %43 = vst.msk [vmem:[%s373_s3 + $0x8] sm:$0xff] %vm19_vm0, %v41_v28 }
 0x146   :  { %238 = dma.done.wait [#allocation3], 256  }
 0x147   :  { %239 = vsyncadd [#allocation3], 4294967040 }
 0x148   :  { %178 = vsyncpa [#allocation3], 1 }

</bundles_post_ra>
